<compile_context>
chip_gen: v7x
topology: tpu7x:2x2x1
jax: 0.10.0
libtpu: 0.0.40
codegen_flags: <defaults>
</compile_context>

<pallas_src>
import functools
import numpy as np
import jax
import jax.numpy as jnp
from jax.experimental import pallas as pl
from jax.experimental.pallas import tpu as pltpu


# activation table: name -> (fn(x, alpha), default_alpha, default_gain)
_ACTIVATIONS = {
    "linear":    (lambda x, a: x,                                     0.0, 1.0),
    "relu":      (lambda x, a: jnp.maximum(x, 0.0),                   0.0, float(np.sqrt(2))),
    "leakyrelu": (lambda x, a: jnp.where(x >= 0, x, x * a),           0.2, float(np.sqrt(2))),
    "tanh":      (lambda x, a: jnp.tanh(x),                           0.0, 1.0),
    "sigmoid":   (lambda x, a: jax.nn.sigmoid(x),                     0.0, 1.0),
    "elu":       (lambda x, a: jnp.where(x >= 0, x, jnp.expm1(x)),    0.0, 1.0),
    "selu":      (lambda x, a: 1.0507009873554805 * jnp.where(
                      x >= 0, x, 1.6732632423543772 * jnp.expm1(x)),  0.0, 1.0),
    "softplus":  (lambda x, a: jax.nn.softplus(x),                    0.0, 1.0),
    "swish":     (lambda x, a: jax.nn.sigmoid(x) * x,                 0.0, float(np.sqrt(2))),
}
_TRANSCENDENTAL_ACTS = {"tanh", "sigmoid", "elu", "selu", "softplus", "swish"}


def _bias_act_kernel(x_ref, b_ref, o_ref, *, act, alpha, gain, clamp, compute_dtype):
    """Elementwise hot path: y = clamp(act(x + b) * gain).

    b_ref is either (tm, 1) (per-row / per-channel bias, broadcast over lanes)
    or (1, tl) (per-lane bias, broadcast over rows); jnp broadcasting handles both.
    """
    x = x_ref[...].astype(compute_dtype)
    b = b_ref[...].astype(compute_dtype)
    y = x + b
    y = _ACTIVATIONS[act][0](y, alpha)
    if gain != 1.0:
        y = y * gain
    if clamp >= 0.0:
        y = jnp.clip(y, -clamp, clamp)
    o_ref[...] = y.astype(o_ref.dtype)


def _chip_defaults():
    """(target_tile_bytes, vmem_limit_bytes, min_grid_steps, bf16_native) per TPU gen."""
    kind = ""
    try:
        kind = jax.devices()[0].device_kind.lower()
    except Exception:  # pragma: no cover - be robust if device query fails
        pass
    if "v7" in kind:
        # 64 MiB physical VMEM, 2 TCs, ~3.2 TB/s HBM: bigger tiles + force >=4 steps.
        return 5 << 20, 48 << 20, 4, True
    if "v6" in kind:
        # 128 MiB physical VMEM.
        return 4 << 20, 64 << 20, 2, True
    # v5e (and unknown): conservative tiles, no native bf16 VPU -> compute in f32.
    return 2 << 20, 32 << 20, 2, False


def _choose_tiles(M, L, itemsize, target_bytes, *, sub_mult=8, min_grid=1):
    """Pick (tm, tl) so the x/out tile is ~target_bytes and (sub_mult, 128)-friendly.

    The lane axis is tiled with a 128-multiple whenever one sub_mult-row stripe of the
    full extent exceeds the byte budget (edge block handled by Pallas masking), so a
    large non-128-aligned L can never blow the scoped-VMEM limit.
    """
    # Lane axis.
    if sub_mult * L * itemsize > target_bytes and L > 128:
        tl = max(128, (target_bytes // (sub_mult * itemsize)) // 128 * 128)
        if tl >= L:
            tl = L
    else:
        tl = L
    # Sublane axis: multiple of sub_mult (full extent when it covers M).
    if M <= sub_mult:
        tm = M
    else:
        rows = max(sub_mult, target_bytes // max(tl * itemsize, 1))
        tm = max(sub_mult, (rows // sub_mult) * sub_mult)
        if tm >= M:
            tm = M
    # Ensure at least `min_grid` steps (pipelining + v7x 2-TC sharding) when possible.
    def _grid(tm_, tl_):
        return pl.cdiv(M, tm_) * pl.cdiv(L, tl_)
    while _grid(tm, tl) < min_grid:
        if tm > sub_mult:
            tm = max(sub_mult, ((tm + 1) // 2 // sub_mult) * sub_mult)
        elif tl > 256:
            tl = max(128, (tl // 2 // 128) * 128)
        else:
            break
    return tm, tl


def fused_bias_act_2d(x2d, bias2d, *, act, alpha, gain, clamp,
                      target_tile_bytes=None, vmem_limit_bytes=None,
                      min_grid_steps=None, donate_x=False):
    """x2d: (M, L) slab. bias2d: (M, 1) per-row bias or (1, L) per-lane bias."""
    M, L = x2d.shape
    per_row_bias = (bias2d.shape[1] == 1)
    itemsize = jnp.dtype(x2d.dtype).itemsize

    tgt_def, vmem_def, min_grid_def, bf16_native = _chip_defaults()
    target_tile_bytes = tgt_def if target_tile_bytes is None else target_tile_bytes
    vmem_limit_bytes = vmem_def if vmem_limit_bytes is None else vmem_limit_bytes
    min_grid_steps = min_grid_def if min_grid_steps is None else min_grid_steps

    # Sub-32-bit dtypes pack along sublanes: round tm to 16 (bf16) / 32 (8-bit).
    sub_mult = max(8, 32 // itemsize)
    # Only force a multi-step grid when the tensor is big enough to benefit.
    min_grid = min_grid_steps if M * L * itemsize >= (256 << 10) else 1

    tm, tl = _choose_tiles(M, L, itemsize, target_tile_bytes,
                           sub_mult=sub_mult, min_grid=min_grid)
    grid = (pl.cdiv(M, tm), pl.cdiv(L, tl))

    if per_row_bias:
        b_spec = pl.BlockSpec((tm, 1), lambda i, j: (i, 0))
    else:
        b_spec = pl.BlockSpec((1, tl), lambda i, j: (0, j))

    # bf16 stays bf16 on-chip only where the VPU is native (v6e/v7x); else f32 compute.
    compute_dtype = x2d.dtype if (x2d.dtype == jnp.bfloat16 and bf16_native) else jnp.float32

    n = M * L
    cost = pl.CostEstimate(
        flops=3 * n,
        transcendentals=(n if act in _TRANSCENDENTAL_ACTS else 0),
        bytes_accessed=2 * n * itemsize
        + int(bias2d.size) * jnp.dtype(bias2d.dtype).itemsize,
    )

    kernel = functools.partial(_bias_act_kernel, act=act, alpha=alpha,
                               gain=gain, clamp=clamp, compute_dtype=compute_dtype)
    return pl.pallas_call(
        kernel,
        out_shape=jax.ShapeDtypeStruct((M, L), x2d.dtype),
        grid_spec=pltpu.PrefetchScalarGridSpec(
            num_scalar_prefetch=0,
            grid=grid,
            in_specs=[
                pl.BlockSpec((tm, tl), lambda i, j: (i, j)),
                b_spec,
            ],
            out_specs=pl.BlockSpec((tm, tl), lambda i, j: (i, j)),
        ),
        compiler_params=pltpu.CompilerParams(
            # Both axes independent -> megacore / v7x 2-TC sharding.
            dimension_semantics=("parallel", "parallel"),
            vmem_limit_bytes=vmem_limit_bytes),
        cost_estimate=cost,
        input_output_aliases=({0: 0} if donate_x else {}),
    )(x2d, bias2d)


class FusedNonlinearityPallas:
    """JAX/Pallas port of FusedNonlinearity (forward only).

    Matches the PyTorch module's forward: y = act(x + bias*lr_mul) * gain, with the
    bias broadcast along dim=1.  clamp defaults to disabled (None), as in the module.
    """

    def __init__(self, nonlinearity, num_channels=None, lr_mul=1.0,
                 alpha=None, gain=None, clamp=None):
        assert nonlinearity in _ACTIVATIONS
        self.nonlinearity = nonlinearity
        _, def_alpha, def_gain = _ACTIVATIONS[nonlinearity]
        self.alpha = float(alpha if alpha is not None else def_alpha)
        self.gain = float(gain if gain is not None else def_gain)
        self.clamp = float(clamp if clamp is not None else -1.0)
        self.lr_mul = float(lr_mul)
        # deterministic parameter init (same as PyTorch: zeros(num_channels))
        self.bias = (jnp.zeros((num_channels,), jnp.float32)
                     if num_channels is not None else None)

    def __call__(self, x):
        assert x.ndim >= 2, "bias is broadcast along dim=1; need ndim >= 2"
        C = x.shape[1]
        if self.bias is not None:
            bias = self.bias.astype(jnp.float32) * self.lr_mul   # cast in-kernel
        else:
            bias = jnp.zeros((C,), jnp.float32)
        kw = dict(act=self.nonlinearity, alpha=self.alpha,
                  gain=self.gain, clamp=self.clamp)

        if x.ndim == 2:
            N = x.shape[0]
            if C < 128:
                # Narrow channel axis -> lane-dense (1, N*C) view; per-lane bias is
                # bias tiled N times (row-major: element n*C + c belongs to channel c).
                y = fused_bias_act_2d(x.reshape(1, N * C),
                                      jnp.tile(bias, (N,)).reshape(1, N * C), **kw)
                return y.reshape(N, C)
            return fused_bias_act_2d(x, bias.reshape(1, C), **kw)

        # (N, C, *spatial): pick the 2-D view that keeps stores lane-dense.
        N = x.shape[0]
        L = int(np.prod(x.shape[2:]))
        padded = pl.cdiv(max(L, 1), 128) * 128
        masked_frac = (padded - L) / padded          # fraction of masked vst lanes
        small_bias_ok = (C * L) <= (1 << 20)         # keep the per-lane bias small

        if masked_frac > 0.05 and small_bias_ok:
            # View B: (N, C*L) slab; per-lane bias repeats each channel's bias L times
            # (row-major: element c*L + s belongs to channel c). Unmasked wide stores.
            x2d = x.reshape(N, C * L)
            bias_lanes = jnp.repeat(bias, L).reshape(1, C * L)
            y2d = fused_bias_act_2d(x2d, bias_lanes, **kw)
        else:
            # View A: (N*C, L) slab; row r belongs to channel r % C, so the bias is a
            # tiny per-row column built by tiling.  Lane axis already 128-friendly.
            M = N * C
            x2d = x.reshape(M, L)
            bias_rows = jnp.tile(bias, (N,)).reshape(M, 1)
            y2d = fused_bias_act_2d(x2d, bias_rows, **kw)
        return y2d.reshape(x.shape)


def _ref_bias_act(x, bias, act, alpha, gain, lr_mul, clamp=-1.0):
    fn, _, _ = _ACTIVATIONS[act]
    xf = x.astype(jnp.float32)
    if bias is not None:
        b = (bias.astype(jnp.float32) * lr_mul).reshape((1, -1) + (1,) * (x.ndim - 2))
        xf = xf + b
    y = fn(xf, alpha)
    if gain != 1.0:
        y = y * gain
    if clamp >= 0.0:
        y = jnp.clip(y, -clamp, clamp)
    return y.astype(x.dtype)


if __name__ == "__main__":
    key = jax.random.PRNGKey(0)
    k1, k2, k3 = jax.random.split(key, 3)

    # 1) NCHW with 128-aligned spatial -> (N*C, S) per-row-bias view, leakyrelu.
    N, C, H, W = 2, 4, 16, 16
    x = jax.random.normal(k1, (N, C, H, W), jnp.float32)
    mod = FusedNonlinearityPallas("leakyrelu", num_channels=C, lr_mul=1.0)
    mod.bias = jnp.arange(C, dtype=jnp.float32) * 0.1   # nonzero bias exercises add path
    y = jax.block_until_ready(mod(x))
    y_ref = _ref_bias_act(x, mod.bias, "leakyrelu", mod.alpha, mod.gain, mod.lr_mul, mod.clamp)
    np.testing.assert_allclose(np.asarray(y), np.asarray(y_ref), rtol=1e-5, atol=1e-5)
    assert y.shape == (N, C, H, W) and y.dtype == x.dtype

    # 2) plain (N, C) with C < 128 -> flattened (1, N*C) lane-dense view, sigmoid.
    x2 = jax.random.normal(k2, (16, C), jnp.float32)
    mod2 = FusedNonlinearityPallas("sigmoid", num_channels=C)
    mod2.bias = jnp.arange(C, dtype=jnp.float32) * 0.05
    y2 = jax.block_until_ready(mod2(x2))
    y2_ref = _ref_bias_act(x2, mod2.bias, "sigmoid", mod2.alpha, mod2.gain, mod2.lr_mul, mod2.clamp)
    np.testing.assert_allclose(np.asarray(y2), np.asarray(y2_ref), rtol=1e-5, atol=1e-5)
    assert y2.shape == x2.shape and y2.dtype == x2.dtype

    # 3) 128-unfriendly spatial (7x7) -> (N, C*S) per-lane-bias view; swish + clamp
    #    (checks clamp-after-gain ordering against the reference).
    x3 = jax.random.normal(k3, (2, 8, 7, 7), jnp.float32)
    mod3 = FusedNonlinearityPallas("swish", num_channels=8, clamp=0.5)
    mod3.bias = jnp.linspace(-0.3, 0.3, 8, dtype=jnp.float32)
    y3 = jax.block_until_ready(mod3(x3))
    y3_ref = _ref_bias_act(x3, mod3.bias, "swish", mod3.alpha, mod3.gain, mod3.lr_mul, mod3.clamp)
    np.testing.assert_allclose(np.asarray(y3), np.asarray(y3_ref), rtol=1e-5, atol=1e-5)
    assert y3.shape == x3.shape and y3.dtype == x3.dtype

    print("KERNEL_OK")
</pallas_src>

<mosaic_0001>
module attributes {stable_mosaic.version = 11 : i64} {
  func.func @_bias_act_kernel(%arg0: i32, %arg1: i32, %arg2: memref<8x256xf32, #tpu.memory_space<vmem>>, %arg3: memref<8x1xf32, #tpu.memory_space<vmem>>, %arg4: memref<8x256xf32, #tpu.memory_space<vmem>>) attributes {dimension_semantics = [#tpu.dimension_semantics<parallel>, #tpu.dimension_semantics<parallel>], iteration_bounds = array<i64: 1, 1>, scalar_prefetch = 0 : i64, scratch_operands = 0 : i64, tpu.core_type = #tpu.core_type<tc>, window_params = [{transform_indices = @transform_0, window_bounds = array<i64: 8, 256>}, {transform_indices = @transform_1, window_bounds = array<i64: 8, 1>}, {transform_indices = @transform_2, window_bounds = array<i64: 8, 256>}]} {
    %c0 = arith.constant 0 : index
    %c0_0 = arith.constant 0 : index
    %0 = vector.load %arg2[%c0, %c0_0] : memref<8x256xf32, #tpu.memory_space<vmem>>, vector<8x256xf32>
    %c0_1 = arith.constant 0 : index
    %c0_2 = arith.constant 0 : index
    %1 = vector.load %arg3[%c0_1, %c0_2] : memref<8x1xf32, #tpu.memory_space<vmem>>, vector<8x1xf32>
    %2 = vector.broadcast %1 : vector<8x1xf32> to vector<8x256xf32>
    %3 = arith.addf %0, %2 : vector<8x256xf32>
    %cst = arith.constant 0.000000e+00 : f32
    %4 = vector.broadcast %cst : f32 to vector<8x256xf32>
    %5 = arith.cmpf oge, %3, %4 : vector<8x256xf32>
    %cst_3 = arith.constant 2.000000e-01 : f32
    %6 = vector.broadcast %cst_3 : f32 to vector<8x256xf32>
    %7 = arith.mulf %3, %6 : vector<8x256xf32>
    %8 = arith.select %5, %3, %7 : vector<8x256xi1>, vector<8x256xf32>
    %cst_4 = arith.constant 1.41421354 : f32
    %9 = vector.broadcast %cst_4 : f32 to vector<8x256xf32>
    %10 = arith.mulf %8, %9 : vector<8x256xf32>
    %c0_5 = arith.constant 0 : index
    %c0_6 = arith.constant 0 : index
    %11 = vector.load %arg4[%c0_5, %c0_6] : memref<8x256xf32, #tpu.memory_space<vmem>>, vector<8x256xf32>
    tpu.vector_store %arg4[%c0_5, %c0_6], %10 {strides = array<i32>} : memref<8x256xf32, #tpu.memory_space<vmem>>, vector<8x256xf32>,
    return
  }
  func.func @transform_0(%arg0: i32, %arg1: i32) -> (i32, i32) {
    %c0_i32 = arith.constant 0 : i32
    return %arg0, %arg1 : i32, i32
  }
  func.func @transform_1(%arg0: i32, %arg1: i32) -> (i32, i32) {
    %c0_i32 = arith.constant 0 : i32
    %c0_i32_0 = arith.constant 0 : i32
    return %arg0, %c0_i32 : i32, i32
  }
  func.func @transform_2(%arg0: i32, %arg1: i32) -> (i32, i32) {
    %c0_i32 = arith.constant 0 : i32
    return %arg0, %arg1 : i32, i32
  }
}

</mosaic_0001>

<bundles_post_ra>
// kernel: tpu_custom_call.1
= control target key start
LH: loop header
LB: loop body
LE: loop exit
PB: predicated region body
PF: predicated region fallthrough
CT: control target
= control target key end

     0   :  { %7 = vsyncpa [#allocation3], 0  ;;  %s156_s0 = inlined_call_operand.hbm [shape: f32[8,256], index: 0, kind: input, shape index: {}]   ;;  %s157_s1 = inlined_call_operand.vmem [shape: f32[8,1], index: 1, kind: input, shape index: {}]   ;;  %s158_s2 = inlined_call_operand.hbm [shape: f32[8,256], index: 2, kind: output, shape index: {}]  }
   0x1   :  { %8 = vsyncpa [#allocation4], 0  ;;  %s111_s9 = smov [#allocation2]   ;;  %s63_s13 = scalar_lea.hbm %s156_s0, 256 }
   0x2   :  { %s15_s10 = sshll.u32 %s111_s9, 4  ;;  %p64_p0 = scmp.ne.s32.totalorder %s156_s0, %s63_s13  ;;  %s16_s10 = int_to_ptr.vmem [resolvable:$true] %s15_s10 }
   0x3   :  { %p67_p1 = scmp.lt.u32.totalorder %s63_s13, %s156_s0 }
   0x5   :  { %p69_p2 = pnand %p67_p1, %p64_p0 }
   0x7   :  { %72 = shalt.err (!%p69_p2)
}
   0x8   :  { %s73_s18 = scalar_lea.vmem %s16_s10, 256  ;;  %p78_p4 = scmp.lt.s32.totalorder %s16_s10, %s16_s10 }
   0x9   :  { %p74_p3 = scmp.ne.s32.totalorder %s16_s10, %s73_s18  ;;  %p79_p5 = scmp.lt.s32.totalorder %s73_s18, %s73_s18 }
   0xb   :  { %p80_p6 = por %p79_p5, %p78_p4 }
   0xd   :  { %p81_p7 = pnand %p80_p6, %p74_p3 }
   0xf   :  { %84 = shalt.err (!%p81_p7)
}
  0x10   :  { %18 = dma.hbm_to_vmem [thread:$0]  %s156_s0, 256, %s16_s10, [#allocation3]  }
  0x11   :  { %107 = dma.done.wait [#allocation3], 256  }
  0x12   :  { %108 = vsyncadd [#allocation3], 4294967040  ;;  %v112_v0 = vmov 0   ;;  %v26_v1 = vld [vmem:[%s157_s1] sm:$0xff]  ;;  %v25_v3 = vld [vmem:[#allocation2 + $0x8] sm:$0xff]  ;;  %s113_s23 = smov [#allocation5]  }
  0x13   :  { %62 = vset.pattern.permute.xlu0 %v112_v0  ;;  %v24_v2 = vld [vmem:[#allocation2] sm:$0xff]  ;;  %s50_s24 = sshll.u32 %s113_s23, 4  ;;  %s51_s24 = int_to_ptr.vmem [resolvable:$true] %s50_s24 }
  0x14   :  { %29 = vperm.xlu0 %62, %v26_v1   ;;  %s85_s0 = scalar_lea.vmem %s51_s24, 256  ;;  %p90_p9 = scmp.lt.s32.totalorder %s51_s24, %s51_s24 }
  0x15   :  { %p86_p8 = scmp.ne.s32.totalorder %s51_s24, %s85_s0  ;;  %p91_p10 = scmp.lt.s32.totalorder %s85_s0, %s85_s0 }
  0x17   :  { %p92_p11 = por %p91_p10, %p90_p9 }
  0x19   :  { %p93_p12 = pnand %p92_p11, %p86_p8 }
  0x93   :  { %v30_v4 = vpop.permute.xlu0 %29 }
  0x94   :  { %v32_v5 = vadd.f32 %v30_v4, %v24_v2  ;;  %v33_v6 = vadd.f32 %v30_v4, %v25_v3 }
  0x96   :  { %vm34_vm0 = vcmp.ge.f32.partialorder %v32_v5, 0.0  ;;  %vm35_vm1 = vcmp.ge.f32.partialorder %v33_v6, 0.0  ;;  %v36_v7 = vmul.f32 0.2, %v32_v5  ;;  %v37_v8 = vmul.f32 0.2, %v33_v6 }
  0x98   :  { %v38_v9 = vsel %vm34_vm0, %v32_v5, %v36_v7  ;;  %v39_v10 = vsel %vm35_vm1, %v33_v6, %v37_v8 }
  0x99   :  { %v40_v11 = vmul.f32 1.4142135, %v38_v9  ;;  %v41_v12 = vmul.f32 1.4142135, %v39_v10 }
  0x9b   :  { %42 = vst [vmem:[#allocation5] sm:$0xff] %v40_v11  ;;  %43 = vst [vmem:[#allocation5 + $0x8] sm:$0xff] %v41_v12 }
  0x9c   :  { %96 = shalt.err (!%p93_p12)
}
  0x9d   :  { %s97_s26 = scalar_lea.hbm %s158_s2, 256 }
  0x9e   :  { %p98_p13 = scmp.ne.s32.totalorder %s158_s2, %s97_s26  ;;  %p101_p0 = scmp.lt.u32.totalorder %s97_s26, %s158_s2 }
  0xa0   :  { %p103_p1 = pnand %p101_p0, %p98_p13 }
  0xa2   :  { %106 = shalt.err (!%p103_p1)
}
  0xa3   :  { %53 = dma.vmem_to_hbm [thread:$0]  %s51_s24, 256, %s158_s2, [#allocation4]  }
  0xa4   :  { %109 = dma.done.wait [#allocation4], 256  }
  0xa5   :  { %110 = vsyncadd [#allocation4], 4294967040 }
  0xa6   :  { %57 = vsyncpa [#allocation3], 1 }
  0xa7   :  { %58 = vsyncpa [#allocation4], 1 }

</bundles_post_ra>
